<compile_context>
chip_gen: v7x
topology: tpu7x:2x2x1
jax: 0.10.0
libtpu: 0.0.40
codegen_flags: <defaults>
</compile_context>

<pallas_src>
import functools

import jax
import jax.numpy as jnp
from jax import lax
from jax.experimental import pallas as pl
from jax.experimental.pallas import tpu as pltpu


def _round_up(n, m):
    return ((n + m - 1) // m) * m


def block_kernel(x_ref, xcol_ref, yrow_ref, w1_ref, b1_ref, w2_ref, b2_ref,
                 w3_ref, b3_ref, o_ref, *, res_scale, ksize, H, W,
                 compute_dtype):
    """One lane-dense (C, P) pixel block: 1x1 -> ReLU -> 1x1 -> kxk -> residual."""
    x_f32 = x_ref[...]                                   # (C, P) f32
    P = x_f32.shape[1]
    pad = ksize // 2

    # ---- 1x1 expand conv + ReLU :  (C_exp, C) @ (C, P) ----------------------
    h1 = jnp.dot(w1_ref[...], x_f32.astype(compute_dtype),
                 preferred_element_type=jnp.float32) + b1_ref[...]
    h1 = jnp.maximum(h1, 0.0)                            # f32 epilogue

    # ---- 1x1 bottleneck conv :  (C_lin, C_exp) @ (C_exp, P) -----------------
    h2 = jnp.dot(w2_ref[...], h1.astype(compute_dtype),
                 preferred_element_type=jnp.float32) + b2_ref[...]  # (C_lin_p, P)

    # ---- k x k SAME conv as ONE im2col matmul (K = k*k*C_lin_p) -------------
    # Shifted windows are XLU lane rotations of the flat pixel axis; border
    # (and cross-image wrap) taps are zeroed with per-pixel masks.  The k
    # column masks and k row masks are built once and reused across taps.
    xcol = xcol_ref[...]                                 # (1, P) int32
    yrow = yrow_ref[...]                                 # (1, P) int32
    col_ok = [(xcol + (dx - pad) >= 0) & (xcol + (dx - pad) < W)
              for dx in range(ksize)]
    row_ok = [(yrow + (dy - pad) >= 0) & (yrow + (dy - pad) < H)
              for dy in range(ksize)]

    wins = []
    for dy in range(ksize):
        for dx in range(ksize):
            s = (dy - pad) * W + (dx - pad)              # flat source offset
            shifted = pltpu.roll(h2, (-s) % P, axis=1) if s % P != 0 else h2
            valid = row_ok[dy] & col_ok[dx]              # (1, P) bool
            wins.append(jnp.where(valid, shifted, 0.0))
    pcols = jnp.concatenate(wins, axis=0) if len(wins) > 1 else wins[0]
    y3 = jnp.dot(w3_ref[...], pcols.astype(compute_dtype),
                 preferred_element_type=jnp.float32) + b3_ref[...]  # (C, P)

    # ---- residual (f32), lane-dense store ------------------------------------
    o_ref[...] = (y3 * res_scale + x_f32).astype(o_ref.dtype)


def _pick_images_per_block(N, HW, bytes_per_pixel, budget_bytes=20 << 20,
                           max_pixels=32 * 1024):
    """Largest whole-image chunk that keeps blocks lane-aligned & VMEM-friendly."""
    limit = max(HW, min(max_pixels, budget_bytes // max(bytes_per_pixel, 1)))
    candidates = [d for d in range(1, N + 1)
                  if N % d == 0 and d * HW <= limit
                  and (d == N or (d * HW) % 128 == 0)]
    return max(candidates) if candidates else N


def wdsr_block(x, params, *, res_scale=1.0, ksize=3,
               compute_dtype=jnp.float32, images_per_block=None):
    """x: (N, C, H, W) float32 (PyTorch NCHW layout)."""
    assert ksize % 2 == 1, "SAME-padding emulation assumes odd kernel size"
    N, C, H, W = x.shape
    w1, b1, w2, b2, w3, b3 = params
    C_exp = w1.shape[0]
    C_lin = w2.shape[0]
    HW = H * W
    P = N * HW

    # Zero-pad hidden channel dims to the f32 sublane tile (8) so every
    # intermediate and the im2col concat stay tile-aligned.  Exact (zeros).
    C_exp_p = _round_up(C_exp, 8)
    C_lin_p = _round_up(C_lin, 8)

    cdt = compute_dtype
    w1p = jnp.zeros((C_exp_p, C), cdt).at[:C_exp, :].set(w1.astype(cdt))
    b1p = jnp.zeros((C_exp_p, 1), jnp.float32).at[:C_exp, 0].set(
        b1.astype(jnp.float32))
    w2p = jnp.zeros((C_lin_p, C_exp_p), cdt).at[:C_lin, :C_exp].set(
        w2.astype(cdt))
    b2p = jnp.zeros((C_lin_p, 1), jnp.float32).at[:C_lin, 0].set(
        b2.astype(jnp.float32))
    # OIHW -> (C_out, kh, kw, C_in_p) -> (C_out, k*k*C_in_p): matches im2col order.
    w3p = jnp.zeros((C, C_lin_p, ksize, ksize), jnp.float32).at[:, :C_lin].set(
        w3.astype(jnp.float32))
    w3m = w3p.transpose(0, 2, 3, 1).reshape(C, ksize * ksize * C_lin_p).astype(cdt)
    b3c = b3.reshape(C, 1).astype(jnp.float32)

    # Tile choice: whole images per block, lane-aligned, VMEM-budgeted.
    if images_per_block is None:
        bytes_per_pixel = 4 * (4 * C + 4 + C_exp_p + C_lin_p
                               + 2 * ksize * ksize * C_lin_p)
        images_per_block = _pick_images_per_block(N, HW, bytes_per_pixel)
    nb = images_per_block
    assert N % nb == 0
    p_blk = nb * HW
    assert p_blk == P or p_blk % 128 == 0, "pixel block must be lane-aligned"
    grid = (N // nb,)

    # Lane-dense compute layout: (N, C, H, W) -> (C, N*H*W).  Plumbing only.
    x_t = x.reshape(N, C, HW).transpose(1, 0, 2).reshape(C, P)

    # Per-pixel (row, col) coordinates, used to mask the conv halo taps.
    pix = jnp.arange(HW, dtype=jnp.int32)
    xcol = jnp.tile(pix % W, (N,)).reshape(1, P)
    yrow = jnp.tile(pix // W, (N,)).reshape(1, P)

    kernel = functools.partial(block_kernel, res_scale=res_scale, ksize=ksize,
                               H=H, W=W, compute_dtype=cdt)
    out_t = pl.pallas_call(
        kernel,
        out_shape=jax.ShapeDtypeStruct((C, P), x.dtype),
        grid_spec=pltpu.PrefetchScalarGridSpec(
            num_scalar_prefetch=0,
            grid=grid,
            in_specs=[
                pl.BlockSpec((C, p_blk), lambda i: (0, i)),
                pl.BlockSpec((1, p_blk), lambda i: (0, i)),
                pl.BlockSpec((1, p_blk), lambda i: (0, i)),
                pl.BlockSpec((C_exp_p, C), lambda i: (0, 0)),
                pl.BlockSpec((C_exp_p, 1), lambda i: (0, 0)),
                pl.BlockSpec((C_lin_p, C_exp_p), lambda i: (0, 0)),
                pl.BlockSpec((C_lin_p, 1), lambda i: (0, 0)),
                pl.BlockSpec((C, ksize * ksize * C_lin_p), lambda i: (0, 0)),
                pl.BlockSpec((C, 1), lambda i: (0, 0)),
            ],
            out_specs=pl.BlockSpec((C, p_blk), lambda i: (0, i)),
        ),
        compiler_params=pltpu.CompilerParams(
            dimension_semantics=("parallel",)),
    )(x_t, xcol, yrow, w1p, b1p, w2p, b2p, w3m, b3c)

    return out_t.reshape(C, N, HW).transpose(1, 0, 2).reshape(N, C, H, W)


def reference(x, params, *, res_scale=1.0):
    """Pure-JAX NCHW reference mirroring the PyTorch forward."""
    w1, b1, w2, b2, w3, b3 = params
    dn = ("NCHW", "OIHW", "NCHW")
    hp = lax.Precision.HIGHEST
    h = lax.conv_general_dilated(x, w1[:, :, None, None], (1, 1), "VALID",
                                 dimension_numbers=dn, precision=hp)
    h = h + b1[None, :, None, None]
    h = jnp.maximum(h, 0.0)
    h = lax.conv_general_dilated(h, w2[:, :, None, None], (1, 1), "VALID",
                                 dimension_numbers=dn, precision=hp)
    h = h + b2[None, :, None, None]
    h = lax.conv_general_dilated(h, w3, (1, 1), "SAME",
                                 dimension_numbers=dn, precision=hp)
    h = h + b3[None, :, None, None]
    return h * res_scale + x


if __name__ == "__main__":
    key = jax.random.PRNGKey(0)
    N, n_feats, H, W = 2, 4, 16, 16
    ksize = 3
    expand, linear = 6, 0.8
    C_exp = n_feats * expand            # 24
    C_lin = int(n_feats * linear)       # 3
    res_scale = 1.0

    ks = jax.random.split(key, 7)
    x = jax.random.normal(ks[0], (N, n_feats, H, W), jnp.float32)

    # Effective (post weight-norm) parameters in PyTorch layout, deterministic.
    w1 = jax.random.normal(ks[1], (C_exp, n_feats), jnp.float32) * 0.1
    b1 = jax.random.normal(ks[2], (C_exp,), jnp.float32) * 0.1
    w2 = jax.random.normal(ks[3], (C_lin, C_exp), jnp.float32) * 0.1
    b2 = jax.random.normal(ks[4], (C_lin,), jnp.float32) * 0.1
    w3 = jax.random.normal(ks[5], (n_feats, C_lin, ksize, ksize), jnp.float32) * 0.1
    b3 = jax.random.normal(ks[6], (n_feats,), jnp.float32) * 0.1
    params = (w1, b1, w2, b2, w3, b3)

    ref = reference(x, params, res_scale=res_scale)

    # f32 matmul operands: faithful to the PyTorch module.
    out = wdsr_block(x, params, res_scale=res_scale, ksize=ksize,
                     compute_dtype=jnp.float32)
    out = jax.block_until_ready(out)
    assert out.shape == (N, n_feats, H, W)
    assert jnp.allclose(out, ref, atol=1e-3, rtol=1e-3), "f32 kernel mismatch"

    # bf16 matmul operands (MXU-native), f32 accumulate + f32 epilogue.
    out_bf16 = wdsr_block(x, params, res_scale=res_scale, ksize=ksize,
                          compute_dtype=jnp.bfloat16)
    out_bf16 = jax.block_until_ready(out_bf16)
    assert jnp.allclose(out_bf16, ref, atol=3e-2, rtol=3e-2), "bf16 kernel mismatch"

    print("KERNEL_OK")
</pallas_src>

<mosaic_0001>
module attributes {stable_mosaic.version = 11 : i64} {
  func.func @block_kernel(%arg0: i32, %arg1: memref<4x512xf32, #tpu.memory_space<vmem>>, %arg2: memref<1x512xi32, #tpu.memory_space<vmem>>, %arg3: memref<1x512xi32, #tpu.memory_space<vmem>>, %arg4: memref<24x4xf32, #tpu.memory_space<vmem>>, %arg5: memref<24x1xf32, #tpu.memory_space<vmem>>, %arg6: memref<8x24xf32, #tpu.memory_space<vmem>>, %arg7: memref<8x1xf32, #tpu.memory_space<vmem>>, %arg8: memref<4x72xf32, #tpu.memory_space<vmem>>, %arg9: memref<4x1xf32, #tpu.memory_space<vmem>>, %arg10: memref<4x512xf32, #tpu.memory_space<vmem>>) attributes {dimension_semantics = [#tpu.dimension_semantics<parallel>], iteration_bounds = array<i64: 1>, scalar_prefetch = 0 : i64, scratch_operands = 0 : i64, tpu.core_type = #tpu.core_type<tc>, window_params = [{transform_indices = @transform_0, window_bounds = array<i64: 4, 512>}, {transform_indices = @transform_1, window_bounds = array<i64: 1, 512>}, {transform_indices = @transform_2, window_bounds = array<i64: 1, 512>}, {pipeline_mode = #tpu.pipeline_mode<synchronous>, transform_indices = @transform_3, window_bounds = array<i64: 24, 4>}, {pipeline_mode = #tpu.pipeline_mode<synchronous>, transform_indices = @transform_4, window_bounds = array<i64: 24, 1>}, {pipeline_mode = #tpu.pipeline_mode<synchronous>, transform_indices = @transform_5, window_bounds = array<i64: 8, 24>}, {pipeline_mode = #tpu.pipeline_mode<synchronous>, transform_indices = @transform_6, window_bounds = array<i64: 8, 1>}, {pipeline_mode = #tpu.pipeline_mode<synchronous>, transform_indices = @transform_7, window_bounds = array<i64: 4, 72>}, {pipeline_mode = #tpu.pipeline_mode<synchronous>, transform_indices = @transform_8, window_bounds = array<i64: 4, 1>}, {transform_indices = @transform_9, window_bounds = array<i64: 4, 512>}]} {
    %c0 = arith.constant 0 : index
    %c0_0 = arith.constant 0 : index
    %0 = vector.load %arg1[%c0, %c0_0] : memref<4x512xf32, #tpu.memory_space<vmem>>, vector<4x512xf32>
    %c0_1 = arith.constant 0 : index
    %c0_2 = arith.constant 0 : index
    %1 = vector.load %arg4[%c0_1, %c0_2] : memref<24x4xf32, #tpu.memory_space<vmem>>, vector<24x4xf32>
    %cst = arith.constant dense<0.000000e+00> : vector<24x512xf32>
    %2 = tpu.matmul %1, %0, %cst {dimension_numbers = #tpu.dot_dimension_numbers<[1], [0], [0], [1], [0, 0, 1, 1], [], []>} : vector<24x4xf32>, vector<4x512xf32>, vector<24x512xf32> -> vector<24x512xf32>
    %c0_3 = arith.constant 0 : index
    %c0_4 = arith.constant 0 : index
    %3 = vector.load %arg5[%c0_3, %c0_4] : memref<24x1xf32, #tpu.memory_space<vmem>>, vector<24x1xf32>
    %4 = vector.broadcast %3 : vector<24x1xf32> to vector<24x512xf32>
    %5 = arith.addf %2, %4 : vector<24x512xf32>
    %cst_5 = arith.constant 0.000000e+00 : f32
    %6 = vector.broadcast %cst_5 : f32 to vector<24x512xf32>
    %7 = arith.maximumf %5, %6 : vector<24x512xf32>
    %c0_6 = arith.constant 0 : index
    %c0_7 = arith.constant 0 : index
    %8 = vector.load %arg6[%c0_6, %c0_7] : memref<8x24xf32, #tpu.memory_space<vmem>>, vector<8x24xf32>
    %cst_8 = arith.constant dense<0.000000e+00> : vector<8x512xf32>
    %9 = tpu.matmul %8, %7, %cst_8 {dimension_numbers = #tpu.dot_dimension_numbers<[1], [0], [0], [1], [0, 0, 1, 1], [], []>} : vector<8x24xf32>, vector<24x512xf32>, vector<8x512xf32> -> vector<8x512xf32>
    %c0_9 = arith.constant 0 : index
    %c0_10 = arith.constant 0 : index
    %10 = vector.load %arg7[%c0_9, %c0_10] : memref<8x1xf32, #tpu.memory_space<vmem>>, vector<8x1xf32>
    %11 = vector.broadcast %10 : vector<8x1xf32> to vector<8x512xf32>
    %12 = arith.addf %9, %11 : vector<8x512xf32>
    %c0_11 = arith.constant 0 : index
    %c0_12 = arith.constant 0 : index
    %13 = vector.load %arg2[%c0_11, %c0_12] : memref<1x512xi32, #tpu.memory_space<vmem>>, vector<1x512xi32>
    %c0_13 = arith.constant 0 : index
    %c0_14 = arith.constant 0 : index
    %14 = vector.load %arg3[%c0_13, %c0_14] : memref<1x512xi32, #tpu.memory_space<vmem>>, vector<1x512xi32>
    %c-1_i32 = arith.constant -1 : i32
    %15 = vector.broadcast %c-1_i32 : i32 to vector<1x512xi32>
    %16 = arith.addi %13, %15 : vector<1x512xi32>
    %c0_i32 = arith.constant 0 : i32
    %17 = vector.broadcast %c0_i32 : i32 to vector<1x512xi32>
    %18 = arith.cmpi sge, %16, %17 : vector<1x512xi32>
    %c-1_i32_15 = arith.constant -1 : i32
    %19 = vector.broadcast %c-1_i32_15 : i32 to vector<1x512xi32>
    %20 = arith.addi %13, %19 : vector<1x512xi32>
    %c16_i32 = arith.constant 16 : i32
    %21 = vector.broadcast %c16_i32 : i32 to vector<1x512xi32>
    %22 = arith.cmpi slt, %20, %21 : vector<1x512xi32>
    %23 = arith.andi %18, %22 : vector<1x512xi1>
    %c0_i32_16 = arith.constant 0 : i32
    %24 = vector.broadcast %c0_i32_16 : i32 to vector<1x512xi32>
    %25 = arith.addi %13, %24 : vector<1x512xi32>
    %c0_i32_17 = arith.constant 0 : i32
    %26 = vector.broadcast %c0_i32_17 : i32 to vector<1x512xi32>
    %27 = arith.cmpi sge, %25, %26 : vector<1x512xi32>
    %c0_i32_18 = arith.constant 0 : i32
    %28 = vector.broadcast %c0_i32_18 : i32 to vector<1x512xi32>
    %29 = arith.addi %13, %28 : vector<1x512xi32>
    %c16_i32_19 = arith.constant 16 : i32
    %30 = vector.broadcast %c16_i32_19 : i32 to vector<1x512xi32>
    %31 = arith.cmpi slt, %29, %30 : vector<1x512xi32>
    %32 = arith.andi %27, %31 : vector<1x512xi1>
    %c1_i32 = arith.constant 1 : i32
    %33 = vector.broadcast %c1_i32 : i32 to vector<1x512xi32>
    %34 = arith.addi %13, %33 : vector<1x512xi32>
    %c0_i32_20 = arith.constant 0 : i32
    %35 = vector.broadcast %c0_i32_20 : i32 to vector<1x512xi32>
    %36 = arith.cmpi sge, %34, %35 : vector<1x512xi32>
    %c1_i32_21 = arith.constant 1 : i32
    %37 = vector.broadcast %c1_i32_21 : i32 to vector<1x512xi32>
    %38 = arith.addi %13, %37 : vector<1x512xi32>
    %c16_i32_22 = arith.constant 16 : i32
    %39 = vector.broadcast %c16_i32_22 : i32 to vector<1x512xi32>
    %40 = arith.cmpi slt, %38, %39 : vector<1x512xi32>
    %41 = arith.andi %36, %40 : vector<1x512xi1>
    %c-1_i32_23 = arith.constant -1 : i32
    %42 = vector.broadcast %c-1_i32_23 : i32 to vector<1x512xi32>
    %43 = arith.addi %14, %42 : vector<1x512xi32>
    %c0_i32_24 = arith.constant 0 : i32
    %44 = vector.broadcast %c0_i32_24 : i32 to vector<1x512xi32>
    %45 = arith.cmpi sge, %43, %44 : vector<1x512xi32>
    %c-1_i32_25 = arith.constant -1 : i32
    %46 = vector.broadcast %c-1_i32_25 : i32 to vector<1x512xi32>
    %47 = arith.addi %14, %46 : vector<1x512xi32>
    %c16_i32_26 = arith.constant 16 : i32
    %48 = vector.broadcast %c16_i32_26 : i32 to vector<1x512xi32>
    %49 = arith.cmpi slt, %47, %48 : vector<1x512xi32>
    %50 = arith.andi %45, %49 : vector<1x512xi1>
    %c0_i32_27 = arith.constant 0 : i32
    %51 = vector.broadcast %c0_i32_27 : i32 to vector<1x512xi32>
    %52 = arith.addi %14, %51 : vector<1x512xi32>
    %c0_i32_28 = arith.constant 0 : i32
    %53 = vector.broadcast %c0_i32_28 : i32 to vector<1x512xi32>
    %54 = arith.cmpi sge, %52, %53 : vector<1x512xi32>
    %c0_i32_29 = arith.constant 0 : i32
    %55 = vector.broadcast %c0_i32_29 : i32 to vector<1x512xi32>
    %56 = arith.addi %14, %55 : vector<1x512xi32>
    %c16_i32_30 = arith.constant 16 : i32
    %57 = vector.broadcast %c16_i32_30 : i32 to vector<1x512xi32>
    %58 = arith.cmpi slt, %56, %57 : vector<1x512xi32>
    %59 = arith.andi %54, %58 : vector<1x512xi1>
    %c1_i32_31 = arith.constant 1 : i32
    %60 = vector.broadcast %c1_i32_31 : i32 to vector<1x512xi32>
    %61 = arith.addi %14, %60 : vector<1x512xi32>
    %c0_i32_32 = arith.constant 0 : i32
    %62 = vector.broadcast %c0_i32_32 : i32 to vector<1x512xi32>
    %63 = arith.cmpi sge, %61, %62 : vector<1x512xi32>
    %c1_i32_33 = arith.constant 1 : i32
    %64 = vector.broadcast %c1_i32_33 : i32 to vector<1x512xi32>
    %65 = arith.addi %14, %64 : vector<1x512xi32>
    %c16_i32_34 = arith.constant 16 : i32
    %66 = vector.broadcast %c16_i32_34 : i32 to vector<1x512xi32>
    %67 = arith.cmpi slt, %65, %66 : vector<1x512xi32>
    %68 = arith.andi %63, %67 : vector<1x512xi1>
    %c17_i32 = arith.constant 17 : i32
    %69 = tpu.dynamic_rotate %12 by %c17_i32 dim 1 : vector<8x512xf32>, i32 -> vector<8x512xf32>
    %70 = arith.andi %50, %23 : vector<1x512xi1>
    %cst_35 = arith.constant 0.000000e+00 : f32
    %71 = vector.shape_cast %70 : vector<1x512xi1> to vector<1x512xi1>
    %72 = vector.broadcast %71 : vector<1x512xi1> to vector<8x512xi1>
    %73 = vector.broadcast %cst_35 : f32 to vector<8x512xf32>
    %74 = arith.select %72, %69, %73 : vector<8x512xi1>, vector<8x512xf32>
    %c16_i32_36 = arith.constant 16 : i32
    %75 = tpu.dynamic_rotate %12 by %c16_i32_36 dim 1 : vector<8x512xf32>, i32 -> vector<8x512xf32>
    %76 = arith.andi %50, %32 : vector<1x512xi1>
    %cst_37 = arith.constant 0.000000e+00 : f32
    %77 = vector.shape_cast %76 : vector<1x512xi1> to vector<1x512xi1>
    %78 = vector.broadcast %77 : vector<1x512xi1> to vector<8x512xi1>
    %79 = vector.broadcast %cst_37 : f32 to vector<8x512xf32>
    %80 = arith.select %78, %75, %79 : vector<8x512xi1>, vector<8x512xf32>
    %c15_i32 = arith.constant 15 : i32
    %81 = tpu.dynamic_rotate %12 by %c15_i32 dim 1 : vector<8x512xf32>, i32 -> vector<8x512xf32>
    %82 = arith.andi %50, %41 : vector<1x512xi1>
    %cst_38 = arith.constant 0.000000e+00 : f32
    %83 = vector.shape_cast %82 : vector<1x512xi1> to vector<1x512xi1>
    %84 = vector.broadcast %83 : vector<1x512xi1> to vector<8x512xi1>
    %85 = vector.broadcast %cst_38 : f32 to vector<8x512xf32>
    %86 = arith.select %84, %81, %85 : vector<8x512xi1>, vector<8x512xf32>
    %c1_i32_39 = arith.constant 1 : i32
    %87 = tpu.dynamic_rotate %12 by %c1_i32_39 dim 1 : vector<8x512xf32>, i32 -> vector<8x512xf32>
    %88 = arith.andi %59, %23 : vector<1x512xi1>
    %cst_40 = arith.constant 0.000000e+00 : f32
    %89 = vector.shape_cast %88 : vector<1x512xi1> to vector<1x512xi1>
    %90 = vector.broadcast %89 : vector<1x512xi1> to vector<8x512xi1>
    %91 = vector.broadcast %cst_40 : f32 to vector<8x512xf32>
    %92 = arith.select %90, %87, %91 : vector<8x512xi1>, vector<8x512xf32>
    %93 = arith.andi %59, %32 : vector<1x512xi1>
    %cst_41 = arith.constant 0.000000e+00 : f32
    %94 = vector.shape_cast %93 : vector<1x512xi1> to vector<1x512xi1>
    %95 = vector.broadcast %94 : vector<1x512xi1> to vector<8x512xi1>
    %96 = vector.broadcast %cst_41 : f32 to vector<8x512xf32>
    %97 = arith.select %95, %12, %96 : vector<8x512xi1>, vector<8x512xf32>
    %c511_i32 = arith.constant 511 : i32
    %98 = tpu.dynamic_rotate %12 by %c511_i32 dim 1 : vector<8x512xf32>, i32 -> vector<8x512xf32>
    %99 = arith.andi %59, %41 : vector<1x512xi1>
    %cst_42 = arith.constant 0.000000e+00 : f32
    %100 = vector.shape_cast %99 : vector<1x512xi1> to vector<1x512xi1>
    %101 = vector.broadcast %100 : vector<1x512xi1> to vector<8x512xi1>
    %102 = vector.broadcast %cst_42 : f32 to vector<8x512xf32>
    %103 = arith.select %101, %98, %102 : vector<8x512xi1>, vector<8x512xf32>
    %c497_i32 = arith.constant 497 : i32
    %104 = tpu.dynamic_rotate %12 by %c497_i32 dim 1 : vector<8x512xf32>, i32 -> vector<8x512xf32>
    %105 = arith.andi %68, %23 : vector<1x512xi1>
    %cst_43 = arith.constant 0.000000e+00 : f32
    %106 = vector.shape_cast %105 : vector<1x512xi1> to vector<1x512xi1>
    %107 = vector.broadcast %106 : vector<1x512xi1> to vector<8x512xi1>
    %108 = vector.broadcast %cst_43 : f32 to vector<8x512xf32>
    %109 = arith.select %107, %104, %108 : vector<8x512xi1>, vector<8x512xf32>
    %c496_i32 = arith.constant 496 : i32
    %110 = tpu.dynamic_rotate %12 by %c496_i32 dim 1 : vector<8x512xf32>, i32 -> vector<8x512xf32>
    %111 = arith.andi %68, %32 : vector<1x512xi1>
    %cst_44 = arith.constant 0.000000e+00 : f32
    %112 = vector.shape_cast %111 : vector<1x512xi1> to vector<1x512xi1>
    %113 = vector.broadcast %112 : vector<1x512xi1> to vector<8x512xi1>
    %114 = vector.broadcast %cst_44 : f32 to vector<8x512xf32>
    %115 = arith.select %113, %110, %114 : vector<8x512xi1>, vector<8x512xf32>
    %c495_i32 = arith.constant 495 : i32
    %116 = tpu.dynamic_rotate %12 by %c495_i32 dim 1 : vector<8x512xf32>, i32 -> vector<8x512xf32>
    %117 = arith.andi %68, %41 : vector<1x512xi1>
    %cst_45 = arith.constant 0.000000e+00 : f32
    %118 = vector.shape_cast %117 : vector<1x512xi1> to vector<1x512xi1>
    %119 = vector.broadcast %118 : vector<1x512xi1> to vector<8x512xi1>
    %120 = vector.broadcast %cst_45 : f32 to vector<8x512xf32>
    %121 = arith.select %119, %116, %120 : vector<8x512xi1>, vector<8x512xf32>
    %122 = tpu.concatenate %74, %80, %86, %92, %97, %103, %109, %115, %121 in 0 : vector<8x512xf32>, vector<8x512xf32>, vector<8x512xf32>, vector<8x512xf32>, vector<8x512xf32>, vector<8x512xf32>, vector<8x512xf32>, vector<8x512xf32>, vector<8x512xf32> -> vector<72x512xf32>
    %c0_46 = arith.constant 0 : index
    %c0_47 = arith.constant 0 : index
    %123 = vector.load %arg8[%c0_46, %c0_47] : memref<4x72xf32, #tpu.memory_space<vmem>>, vector<4x72xf32>
    %cst_48 = arith.constant dense<0.000000e+00> : vector<4x512xf32>
    %124 = tpu.matmul %123, %122, %cst_48 {dimension_numbers = #tpu.dot_dimension_numbers<[1], [0], [0], [1], [0, 0, 1, 1], [], []>} : vector<4x72xf32>, vector<72x512xf32>, vector<4x512xf32> -> vector<4x512xf32>
    %c0_49 = arith.constant 0 : index
    %c0_50 = arith.constant 0 : index
    %125 = vector.load %arg9[%c0_49, %c0_50] : memref<4x1xf32, #tpu.memory_space<vmem>>, vector<4x1xf32>
    %126 = vector.broadcast %125 : vector<4x1xf32> to vector<4x512xf32>
    %127 = arith.addf %124, %126 : vector<4x512xf32>
    %cst_51 = arith.constant 1.000000e+00 : f32
    %128 = vector.broadcast %cst_51 : f32 to vector<4x512xf32>
    %129 = arith.mulf %127, %128 : vector<4x512xf32>
    %130 = arith.addf %129, %0 : vector<4x512xf32>
    %c0_52 = arith.constant 0 : index
    %c0_53 = arith.constant 0 : index
    %131 = vector.load %arg10[%c0_52, %c0_53] : memref<4x512xf32, #tpu.memory_space<vmem>>, vector<4x512xf32>
    tpu.vector_store %arg10[%c0_52, %c0_53], %130 {strides = array<i32>} : memref<4x512xf32, #tpu.memory_space<vmem>>, vector<4x512xf32>,
    return
  }
  func.func @transform_0(%arg0: i32) -> (i32, i32) {
    %c0_i32 = arith.constant 0 : i32
    %c0_i32_0 = arith.constant 0 : i32
    return %c0_i32, %arg0 : i32, i32
  }
  func.func @transform_1(%arg0: i32) -> (i32, i32) {
    %c0_i32 = arith.constant 0 : i32
    %c0_i32_0 = arith.constant 0 : i32
    return %c0_i32, %arg0 : i32, i32
  }
  func.func @transform_2(%arg0: i32) -> (i32, i32) {
    %c0_i32 = arith.constant 0 : i32
    %c0_i32_0 = arith.constant 0 : i32
    return %c0_i32, %arg0 : i32, i32
  }
  func.func @transform_3(%arg0: i32) -> (i32, i32) {
    %c0_i32 = arith.constant 0 : i32
    %c0_i32_0 = arith.constant 0 : i32
    %c0_i32_1 = arith.constant 0 : i32
    return %c0_i32, %c0_i32_0 : i32, i32
  }
  func.func @transform_4(%arg0: i32) -> (i32, i32) {
    %c0_i32 = arith.constant 0 : i32
    %c0_i32_0 = arith.constant 0 : i32
    %c0_i32_1 = arith.constant 0 : i32
    return %c0_i32, %c0_i32_0 : i32, i32
  }
  func.func @transform_5(%arg0: i32) -> (i32, i32) {
    %c0_i32 = arith.constant 0 : i32
    %c0_i32_0 = arith.constant 0 : i32
    %c0_i32_1 = arith.constant 0 : i32
    return %c0_i32, %c0_i32_0 : i32, i32
  }
  func.func @transform_6(%arg0: i32) -> (i32, i32) {
    %c0_i32 = arith.constant 0 : i32
    %c0_i32_0 = arith.constant 0 : i32
    %c0_i32_1 = arith.constant 0 : i32
    return %c0_i32, %c0_i32_0 : i32, i32
  }
  func.func @transform_7(%arg0: i32) -> (i32, i32) {
    %c0_i32 = arith.constant 0 : i32
    %c0_i32_0 = arith.constant 0 : i32
    %c0_i32_1 = arith.constant 0 : i32
    return %c0_i32, %c0_i32_0 : i32, i32
  }
  func.func @transform_8(%arg0: i32) -> (i32, i32) {
    %c0_i32 = arith.constant 0 : i32
    %c0_i32_0 = arith.constant 0 : i32
    %c0_i32_1 = arith.constant 0 : i32
    return %c0_i32, %c0_i32_0 : i32, i32
  }
  func.func @transform_9(%arg0: i32) -> (i32, i32) {
    %c0_i32 = arith.constant 0 : i32
    %c0_i32_0 = arith.constant 0 : i32
    return %c0_i32, %arg0 : i32, i32
  }
}

</mosaic_0001>

<bundles_post_ra>
// kernel: tpu_custom_call.1
= control target key start
LH: loop header
LB: loop body
LE: loop exit
PB: predicated region body
PF: predicated region fallthrough
CT: control target
= control target key end

     0   :  { %vm70_vm0 = vcmask 1043456   ;;  %v1172_v4 = vmov 0.0   ;;  %vm60_vm1 = vcmask 31744   ;;  %v1173_v6 = vmov 0   ;;  %s1822_s0 = inlined_call_operand.vmem [shape: f32[4,512], index: 0, kind: input, shape index: {}]   ;;  %s1823_s1 = inlined_call_operand.vmem [shape: s32[1,512], index: 1, kind: input, shape index: {}]   ;;  %s1824_s2 = inlined_call_operand.vmem [shape: s32[1,512], index: 2, kind: input, shape index: {}]   ;;  %s1825_s3 = inlined_call_operand.vmem [shape: f32[24,4], index: 3, kind: input, shape index: {}]   ;;  %s1826_s4 = inlined_call_operand.vmem [shape: f32[24,1], index: 4, kind: input, shape index: {}]   ;;  %s1827_s5 = inlined_call_operand.vmem [shape: f32[8,24], index: 5, kind: input, shape index: {}]   ;;  %s1828_s6 = inlined_call_operand.vmem [shape: f32[8,1], index: 6, kind: input, shape index: {}]   ;;  %s1829_s7 = inlined_call_operand.vmem [shape: f32[4,72], index: 7, kind: input, shape index: {}]   ;;  %s1830_s8 = inlined_call_operand.vmem [shape: f32[4,1], index: 8, kind: input, shape index: {}]   ;;  %s1831_s9 = inlined_call_operand.hbm [shape: f32[4,512], index: 9, kind: output, shape index: {}]  }
   0x1   :  { %v1236_v0 = vld [vmem:[%s1822_s0] sm:$0xff]  ;;  %v1241_v1 = vld [vmem:[%s1822_s0 + $0x8] sm:$0xff]  ;;  %143 = vmatprep.mubr.f32.mxu0 %v1172_v4  ;;  %226 = vmatprep.mubr.f32.mxu1 %v1172_v4 }
   0x2   :  { %v1245_v2 = vcombine.high %v1236_v0, %v1236_v0  ;;  %v1249_v3 = vcombine.high %v1241_v1, %v1241_v1  ;;  %v35_v5 = vld [vmem:[%s1825_s3] sm:$0xff]  ;;  %1074 = vset.pattern.permute.xlu0 %v1173_v6  ;;  %1075 = vset.pattern.permute.xlu1 %v1173_v6 }
   0x4   :  { %957 = vmatprep.subr.msk.mxu0 %vm70_vm0, %v1245_v2  ;;  %962 = vmatprep.subr.msk.mxu1 %vm70_vm0, %v1249_v3 }
   0x5   :  { %14 = vsyncpa [#allocation3], 0  ;;  %958 = vmatpush1.msk.msra.mxu0 %vm70_vm0, %v1236_v0  ;;  %963 = vmatpush1.msk.msra.mxu1 %vm70_vm0, %v1241_v1  ;;  %v38_v7 = vld [vmem:[%s1826_s4] sm:$0xff]  ;;  %v40_v8 = vld [vmem:[%s1826_s4 + $0x10] sm:$0xff]  ;;  %vm264_vm2 = vcmask 195584   ;;  %s1176_s26 = smov 15  }
   0x6   :  { %959 = vmatmul.mubr.msk.f32.vlgmr.msra.gmra.mrb[0].mxu0 %vm60_vm1, %v35_v5  ;;  %964 = vmatmul.mubr.msk.f32.vlgmr.msra.gmra.mrb[0].mxu1 %vm60_vm1, %v35_v5  ;;  %v36_v9 = vld [vmem:[%s1825_s3 + $0x8] sm:$0xff]  ;;  %v258_v11 = vld [vmem:[%s1828_s6] sm:$0xff]  ;;  %v37_v12 = vld [vmem:[%s1825_s3 + $0x10] sm:$0xff]  ;;  %s1175_s6 = smov 16   ;;  %s1177_s27 = smov 1  }
   0x7   :  { %149 = vmatprep.mubr.f32.mxu0 %v1172_v4  ;;  %232 = vmatprep.mubr.f32.mxu1 %v1172_v4  ;;  %v39_v10 = vld [vmem:[%s1826_s4 + $0x8] sm:$0xff]  ;;  %v257_v56 = vld [vmem:[%s1827_s5] sm:$0xff]  ;;  %s1174_s5 = smov 17   ;;  %s1178_s28 = smov 127  }
   0x8   :  { %43 = vperm.xlu0 %1074, %v38_v7   ;;  %53 = vperm.xlu1 %1075, %v40_v8   ;;  %s1179_s29 = smov 113   ;;  %s1180_s30 = smov 112  }
   0x9   :  { %s1181_s10 = smov 111  }
   0xa   :  { %960 = vmatmul.mubr.msk.f32.gmra.mrb[2].mxu0 %vm60_vm1, %v36_v9  ;;  %965 = vmatmul.mubr.msk.f32.gmra.mrb[2].mxu1 %vm60_vm1, %v36_v9 }
   0xb   :  { %155 = vmatprep.mubr.f32.mxu0 %v1172_v4  ;;  %238 = vmatprep.mubr.f32.mxu1 %v1172_v4 }
   0xc   :  { %48 = vperm.xlu0 %1074, %v39_v10   ;;  %261 = vperm.xlu1 %1075, %v258_v11   ;;  %v410_v10 = vld [vmem:[%s1823_s1] sm:$0xf] }
   0xd   :  { %v411_v11 = vld [vmem:[%s1824_s2] sm:$0xf]  ;;  %vm416_vm7 = vcmp.ge.s32.totalorder %v410_v10, 0  ;;  %vm417_vm8 = vcmp.lt.s32.totalorder %v410_v10, 16 }
   0xe   :  { %961 = vmatmul.mubr.msk.f32.gmra.mrb[4].mxu0 %vm60_vm1, %v37_v12  ;;  %966 = vmatmul.mubr.msk.f32.gmra.mrb[4].mxu1 %vm60_vm1, %v37_v12  ;;  %v412_v12 = vadd.s32 4294967295, %v410_v10  ;;  %vm1334_vm11 = vmand %vm416_vm7, %vm417_vm8  ;;  %vm427_vm15 = vcmp.ge.s32.totalorder %v411_v11, 0  ;;  %vm428_vm0 = vcmp.lt.s32.totalorder %v411_v11, 16 }
   0xf   :  { %332 = vmatprep.mubr.f32.mxu0 %v1172_v4  ;;  %403 = vmatprep.mubr.f32.mxu1 %v1172_v4 }
  0x10   :  { %vm413_vm3 = vcmp.ge.s32.totalorder %v412_v12, 0  ;;  %vm414_vm4 = vcmp.lt.s32.totalorder %v412_v12, 16  ;;  %v1878_v12 = vmov 0 }
  0x11   :  { %vm1326_vm9 = vmand %vm413_vm3, %vm414_vm4 }
  0x12   :  { %vm1356_vm3 = vmand %vm427_vm15, %vm428_vm0 }
  0x87   :  { %v44_v13 = vpop.permute.xlu0 %43  ;;  %v54_v35 = vpop.permute.xlu1 %53 }
  0x8b   :  { %v49_v20 = vpop.permute.xlu0 %48  ;;  %v262_v57 = vpop.permute.xlu1 %261 }
  0xd9   :  { %v145_v14 = vpop.f32.mrb[0].mxu0  ;;  %v228_v15 = vpop.f32.mrb[0].mxu1 }
  0xda   :  { %v147_v16 = vpop.f32.mrb[1].mxu0  ;;  %v230_v17 = vpop.f32.mrb[1].mxu1  ;;  %v146_v18 = vadd.f32 %v145_v14, %v44_v13  ;;  %v229_v19 = vadd.f32 %v228_v15, %v44_v13  ;;  %v419_v14 = vadd.s32 1, %v410_v10 }
  0xdb   :  { %v148_v21 = vadd.f32 %v147_v16, %v44_v13  ;;  %v231_v22 = vadd.f32 %v230_v17, %v44_v13  ;;  %v423_v13 = vadd.s32 4294967295, %v411_v11  ;;  %v442_v16 = vlaneseq }
  0xdc   :  { %v245_v31 = vmax.f32 %v146_v18, 0.0  ;;  %v247_v32 = vmax.f32 %v229_v19, 0.0  ;;  %vm420_vm12 = vcmp.ge.s32.totalorder %v419_v14, 0  ;;  %vm421_vm13 = vcmp.lt.s32.totalorder %v419_v14, 16 }
  0xdd   :  { %v151_v23 = vpop.f32.mrb[2].mxu0  ;;  %v234_v24 = vpop.f32.mrb[2].mxu1  ;;  %v246_v36 = vmax.f32 %v148_v21, 0.0  ;;  %v248_v37 = vmax.f32 %v231_v22, 0.0  ;;  %vm424_vm5 = vcmp.ge.s32.totalorder %v423_v13, 0  ;;  %vm425_vm6 = vcmp.lt.s32.totalorder %v423_v13, 16 }
  0xde   :  { %v152_v25 = vadd.f32 %v151_v23, %v49_v20  ;;  %v235_v26 = vadd.f32 %v234_v24, %v49_v20  ;;  %v153_v27 = vpop.f32.mrb[3].mxu0  ;;  %v236_v28 = vpop.f32.mrb[3].mxu1  ;;  %vm1330_vm10 = vmand %vm424_vm5, %vm425_vm6  ;;  %v452_v19 = vshrl.u32 %v442_v16, 7  ;;  %v1880_v13 = vmov 0 }
  0xdf   :  { %v154_v29 = vadd.f32 %v153_v27, %v49_v20  ;;  %v237_v30 = vadd.f32 %v236_v28, %v49_v20  ;;  %vm449_vm14 = vmand %vm1330_vm10, %vm1326_vm9  ;;  %v1856_v20 = vmov 0  ;;  %v430_v27 = vadd.s32 1, %v411_v11 }
  0xe0   :  { %v249_v33 = vmax.f32 %v152_v25, 0.0  ;;  %v251_v34 = vmax.f32 %v235_v26, 0.0  ;;  %vm488_vm1 = vmand %vm1330_vm10, %vm1334_vm11  ;;  %v1350_v21 = vsub.s32 1, %v452_v19  ;;  %v1352_v22 = vsub.s32 3, %v452_v19 }
  0xe1   :  { %v250_v38 = vmax.f32 %v154_v29, 0.0  ;;  %v252_v39 = vmax.f32 %v237_v30, 0.0  ;;  %v157_v40 = vpop.f32.mrb[4].mxu0  ;;  %v240_v41 = vpop.f32.mrb[4].mxu1  ;;  %v1354_v23 = vsub.s32 0, %v452_v19  ;;  %v450_v25 = vsel %vm449_vm14, 1, %v1173_v6  ;;  %vm566_vm5 = vmand %vm1356_vm3, %vm1326_vm9 }
  0xe2   :  { %v1009_v42 = vpack.c.bf16 %v249_v33, %v245_v31  ;;  %v1013_v43 = vpack.c.bf16 %v251_v34, %v247_v32  ;;  %v159_v44 = vpop.f32.mrb[5].mxu0  ;;  %v242_v45 = vpop.f32.mrb[5].mxu1  ;;  %v158_v50 = vadd.f32 %v157_v40, %v54_v35  ;;  %v241_v51 = vadd.f32 %v240_v41, %v54_v35  ;;  %vm592_vm6 = vmand %vm1356_vm3, %vm1334_vm11 }
  0xe3   :  { %v1007_v46 = vpack.c.bf16 %v250_v38, %v246_v36  ;;  %v1011_v47 = vpack.c.bf16 %v252_v39, %v248_v37  ;;  %v160_v48 = vadd.f32 %v159_v44, %v54_v35  ;;  %v243_v49 = vadd.f32 %v242_v45, %v54_v35 }
  0xe4   :  { %v253_v54 = vmax.f32 %v158_v50, 0.0  ;;  %v255_v55 = vmax.f32 %v241_v51, 0.0  ;;  %v489_v26 = vsel %vm488_vm1, 1, %v1173_v6  ;;  %v1366_v28 = vand.u32 127, %v442_v16 }
  0xe5   :  { %v254_v52 = vmax.f32 %v160_v48, 0.0  ;;  %v256_v53 = vmax.f32 %v243_v49, 0.0  ;;  %1008 = vmatprep.subr.bf16.mxu0 %v1007_v46  ;;  %1012 = vmatprep.subr.bf16.mxu1 %v1011_v47  ;;  %v1368_v29 = vsub.s32 2, %v452_v19  ;;  %v458_v30 = vrot.slane %v450_v25, %v1350_v21 }
  0xe6   :  { %1010 = vmatpush1.bf16.msra.mxu0 %v1009_v42  ;;  %1014 = vmatpush1.bf16.msra.mxu1 %v1013_v43  ;;  %v497_v31 = vrot.slane %v489_v26, %v1350_v21  ;;  %v466_v32 = vrot.slane %v450_v25, %v1352_v22  ;;  %v454_v33 = vrot.slane %v450_v25, %v1354_v23  ;;  %v567_v37 = vsel %vm566_vm5, 1, %v1173_v6 }
  0xe7   :  { %272 = vmatprep.subr.mxu0 %v254_v52  ;;  %343 = vmatprep.subr.mxu1 %v256_v53  ;;  %v505_v34 = vrot.slane %v489_v26, %v1352_v22  ;;  %v493_v35 = vrot.slane %v489_v26, %v1354_v23  ;;  %vm431_vm8 = vcmp.ge.s32.totalorder %v430_v27, 0  ;;  %v462_v38 = vrot.slane %v450_v25, %v1368_v29 }
  0xe8   :  { %v501_v39 = vrot.slane %v489_v26, %v1368_v29  ;;  %vm1394_vm14 = vcmp.eq.s32.totalorder %v458_v30, 1  ;;  %vm1398_vm15 = vcmp.eq.s32.totalorder %v497_v31, 1  ;;  %vm1402_vm0 = vcmp.eq.s32.totalorder %v466_v32, 1 }
  0xe9   :  { %vm1406_vm1 = vcmp.eq.s32.totalorder %v454_v33, 1  ;;  %v575_v45 = vrot.slane %v567_v37, %v1350_v21  ;;  %v1418_v46 = vsel %vm592_vm6, 1, %v1173_v6  ;;  %vm1427_vm5 = vcmp.eq.s32.totalorder %v505_v34, 1 }
  0xea   :  { %273 = vmatpush1.msra.mxu0 %v253_v54  ;;  %344 = vmatpush1.msra.mxu1 %v255_v55  ;;  %v583_v52 = vrot.slane %v567_v37, %v1352_v22  ;;  %vm1441_vm6 = vcmp.eq.s32.totalorder %v501_v39, 1  ;;  %v1882_v14 = vmov 0  ;;  %v1884_v16 = vmov 0 }
  0xeb   :  { %967 = vmatmul.mubr.msk.f32.vlgmr.msra.gmra.mrb[6].mxu0 %vm264_vm2, %v257_v56  ;;  %968 = vmatmul.mubr.msk.f32.vlgmr.msra.gmra.mrb[6].mxu1 %vm264_vm2, %v257_v56  ;;  %vm1346_vm2 = vmand %vm420_vm12, %vm421_vm13  ;;  %vm1431_vm13 = vcmp.eq.s32.totalorder %v493_v35, 1  ;;  %v1876_v56 = vmov 0  ;;  %v609_v17 = vrot.slane %v1418_v46, %v1352_v22  ;;  %v597_v24 = vrot.slane %v1418_v46, %v1354_v23 }
  0xec   :  { %849 = vmatprep.mubr.f32.mxu0 %v1172_v4  ;;  %920 = vmatprep.mubr.f32.mxu1 %v1172_v4  ;;  %v775_v4 = vld [vmem:[%s1830_s8] sm:$0xf]  ;;  %v1857_v20 = vsel %vm1346_vm2, 4294967295, %v1856_v20  ;;  %vm527_vm4 = vmand %vm1330_vm10, %vm1346_vm2  ;;  %vm432_vm10 = vcmp.lt.s32.totalorder %v430_v27, 16  ;;  %v1877_v56 = vsel %vm1441_vm6, 4294967295, %v1876_v56  ;;  %vm1470_vm6 = vcmp.eq.s32.totalorder %v583_v52, 1 }
  0xed   :  { %v528_v36 = vsel %vm527_vm4, 1, %v1173_v6  ;;  %vm631_vm7 = vmand %vm1356_vm3, %vm1346_vm2  ;;  %vm1437_vm3 = vcmp.eq.s32.totalorder %v462_v38, 1  ;;  %v1885_v16 = vsel %vm1470_vm6, 4294967295, %v1884_v16  ;;  %v1886_v27 = vmov 0 }
  0xee   :  { %v536_v44 = vrot.slane %v528_v36, %v1350_v21  ;;  %v1421_v47 = vsel %vm631_vm7, 1, %v1173_v6  ;;  %vm1423_vm4 = vmand %vm431_vm8, %vm432_vm10  ;;  %v544_v51 = vrot.slane %v528_v36, %v1352_v22  ;;  %vm1461_vm10 = vcmp.eq.s32.totalorder %v575_v45, 1 }
  0xef   :  { %v1881_v13 = vsel %vm1461_vm10, 4294967295, %v1880_v13  ;;  %v648_v19 = vrot.slane %v1421_v47, %v1352_v22  ;;  %v1888_v30 = vmov 0  ;;  %v636_v31 = vrot.slane %v1421_v47, %v1354_v23  ;;  %vm1890_vm12 = vmand %vm1423_vm4, %vm1326_vm9 }
  0xf0   :  { %vm1457_vm8 = vcmp.eq.s32.totalorder %v536_v44, 1  ;;  %vm1466_vm2 = vcmp.eq.s32.totalorder %v544_v51, 1  ;;  %v605_v32 = vrot.slane %v1418_v46, %v1368_v29  ;;  %v644_v33 = vrot.slane %v1421_v47, %v1368_v29 }
  0xf1   :  { %v1879_v12 = vsel %vm1457_vm8, 4294967295, %v1878_v12  ;;  %v1883_v14 = vsel %vm1466_vm2, 4294967295, %v1882_v14  ;;  %v1501_v34 = vsel %vm1890_vm12, 1, %v1173_v6  ;;  %v1891_v39 = vmov 0 }
  0xf2   :  { %v1893_v44 = vmov 0  ;;  %vm1895_vm9 = vcmp.lt.s32.totalorder %v1366_v28, 17  ;;  %v1899_v51 = vmov 0  ;;  %v1901_v52 = vmov 0 }
  0xf3   :  { %vm1896_vm12 = vmmov %vm1895_vm9  ;;  %v1912_v43 = vmov 0  ;;  %v1917_v18 = vmov 0  ;;  %v1921_v41 = vmov 0  ;;  %v679_v40 = vrot.slane %v1501_v34, %v1350_v21 }
  0xf4   :  { %vm1897_vm10 = vmmov %vm1895_vm9 }
  0xf5   :  { %vm1898_vm8 = vmmov %vm1895_vm9 }
 0x1be   :  { %v334_v58 = vpop.f32.mrb[6].mxu0  ;;  %v405_v59 = vpop.f32.mrb[6].mxu1 }
 0x1bf   :  { %v1301_v60 = vadd.f32 %v334_v58, %v262_v57  ;;  %v1303_v61 = vadd.f32 %v405_v59, %v262_v57  ;;  %v336_v62 = vpop.f32.mrb[7].mxu0  ;;  %v407_v63 = vpop.f32.mrb[7].mxu1  ;;  %v571_v58 = vrot.slane %v567_v37, %v1354_v23  ;;  %v540_v59 = vrot.slane %v528_v36, %v1368_v29 }
 0x1c0   :  { %v1305_v5 = vadd.f32 %v336_v62, %v262_v57  ;;  %v1307_v7 = vadd.f32 %v407_v63, %v262_v57  ;;  %v532_v57 = vrot.slane %v528_v36, %v1354_v23  ;;  %v579_v62 = vrot.slane %v567_v37, %v1368_v29 }
 0x1c1   :  { %v601_v63 = vrot.slane %v1418_v46, %v1350_v21  ;;  %vm1485_vm2 = vcmp.eq.s32.totalorder %v571_v58, 1 }
 0x1c2   :  { %v1081_v8 = vpack.i.bf16 %v1307_v7, %v1303_v61  ;;  %v1076_v9 = vpack.i.bf16 %v1305_v5, %v1301_v60  ;;  %vm1481_vm7 = vcmp.eq.s32.totalorder %v532_v57, 1  ;;  %v1889_v30 = vsel %vm1485_vm2, 4294967295, %v1888_v30 }
 0x1c3   :  { %v1887_v27 = vsel %vm1481_vm7, 4294967295, %v1886_v27  ;;  %vm1507_vm7 = vcmp.eq.s32.totalorder %v540_v59, 1  ;;  %vm1511_vm6 = vcmp.eq.s32.totalorder %v579_v62, 1  ;;  %vm1523_vm2 = vcmp.eq.s32.totalorder %v601_v63, 1 }
 0x1c4   :  { %1082 = vrot.lane.b32.xlu1 %v1081_v8, %s1174_s5  ;;  %1077 = vrot.lane.b32.xlu0 %v1076_v9, %s1174_s5  ;;  %v1892_v39 = vsel %vm1507_vm7, 4294967295, %v1891_v39  ;;  %v1894_v44 = vsel %vm1511_vm6, 4294967295, %v1893_v44  ;;  %v1900_v51 = vsel %vm1523_vm2, 4294967295, %v1899_v51  ;;  %vm1564_vm6 = vcmp.eq.s32.totalorder %v597_v24, 1 }
 0x1c5   :  { %v1913_v43 = vsel %vm1564_vm6, 4294967295, %v1912_v43 }
 0x1c8   :  { %1092 = vrot.lane.b32.xlu1 %v1081_v8, %s1175_s6  ;;  %1087 = vrot.lane.b32.xlu0 %v1076_v9, %s1175_s6 }
 0x1cc   :  { %1102 = vrot.lane.b32.xlu1 %v1081_v8, %s1176_s26  ;;  %1097 = vrot.lane.b32.xlu0 %v1076_v9, %s1176_s26 }
 0x1d0   :  { %1112 = vrot.lane.b32.xlu1 %v1081_v8, %s1177_s27  ;;  %1107 = vrot.lane.b32.xlu0 %v1076_v9, %s1177_s27 }
 0x1d4   :  { %1122 = vrot.lane.b32.xlu1 %v1081_v8, %s1178_s28  ;;  %1117 = vrot.lane.b32.xlu0 %v1076_v9, %s1178_s28 }
 0x1d8   :  { %1132 = vrot.lane.b32.xlu1 %v1081_v8, %s1179_s29  ;;  %1127 = vrot.lane.b32.xlu0 %v1076_v9, %s1179_s29 }
 0x1dc   :  { %1142 = vrot.lane.b32.xlu1 %v1081_v8, %s1180_s30  ;;  %1137 = vrot.lane.b32.xlu0 %v1076_v9, %s1180_s30  ;;  %v640_v8 = vrot.slane %v1421_v47, %v1350_v21 }
 0x1de   :  { %vm1527_vm7 = vcmp.eq.s32.totalorder %v640_v8, 1 }
 0x1df   :  { %v1902_v52 = vsel %vm1527_vm7, 4294967295, %v1901_v52  ;;  %vm1560_vm7 = vcmp.eq.s32.totalorder %v648_v19, 1  ;;  %v1919_v19 = vmov 0 }
 0x1e0   :  { %737 = vrot.lane.b32.xlu1 %v1305_v5, %s1181_s10  ;;  %735 = vrot.lane.b32.xlu0 %v1301_v60, %s1181_s10  ;;  %vm1941_vm6 = vnez %v1902_v52 }
 0x1e4   :  { %741 = vrot.lane.b32.xlu1 %v1307_v7, %s1181_s10  ;;  %739 = vrot.lane.b32.xlu0 %v1303_v61, %s1181_s10 }
 0x1e8   :  { %778 = vperm.xlu0 %1074, %v775_v4  }
 0x236   :  { %v1083_v53 = vpop.permute.xlu1 %1082  ;;  %v1078_v54 = vpop.permute.xlu0 %1077 }
 0x237   :  { %v1085_v9 = vunpack.i.h.bf16 %v1083_v53  ;;  %v1084_v4 = vunpack.i.l.bf16 %v1083_v53  ;;  %v1080_v10 = vunpack.i.h.bf16 %v1078_v54  ;;  %v1079_v11 = vunpack.i.l.bf16 %v1078_v54 }
 0x239   :  { %v445_v15 = vsel %vm1895_vm9, %v1084_v4, %v1085_v9  ;;  %v446_v45 = vsel %vm1896_vm12, %v1080_v10, %v1084_v4  ;;  %v447_v46 = vsel %vm1897_vm10, %v1079_v11, %v1080_v10  ;;  %v448_v47 = vsel %vm1898_vm8, %v1085_v9, %v1079_v11 }
 0x23a   :  { %v1093_v25 = vpop.permute.xlu1 %1092  ;;  %v1088_v26 = vpop.permute.xlu0 %1087  ;;  %vm1903_vm12 = vcmp.lt.s32.totalorder %v1366_v28, 16  ;;  %vm1556_vm9 = vcmp.eq.s32.totalorder %v609_v17, 1  ;;  %v1908_v10 = vmov 0  ;;  %v1910_v11 = vmov 0 }
 0x23b   :  { %v1095_v35 = vunpack.i.h.bf16 %v1093_v25  ;;  %v1094_v36 = vunpack.i.l.bf16 %v1093_v25  ;;  %v1090_v37 = vunpack.i.h.bf16 %v1088_v26  ;;  %v1089_v38 = vunpack.i.l.bf16 %v1088_v26  ;;  %vm1904_vm10 = vmmov %vm1903_vm12 }
 0x23c   :  { %vm1905_vm8 = vmmov %vm1904_vm10  ;;  %v1909_v10 = vsel %vm1556_vm9, 4294967295, %v1908_v10  ;;  %v1911_v11 = vsel %vm1560_vm7, 4294967295, %v1910_v11 }
 0x23d   :  { %v484_v53 = vsel %vm1903_vm12, %v1094_v36, %v1095_v35  ;;  %v485_v54 = vsel %vm1904_vm10, %v1090_v37, %v1094_v36  ;;  %v486_v57 = vsel %vm1905_vm8, %v1089_v38, %v1090_v37  ;;  %vm1906_vm2 = vmmov %vm1905_vm8  ;;  %vm1594_vm8 = vcmp.eq.s32.totalorder %v644_v33, 1 }
 0x23e   :  { %v487_v58 = vsel %vm1906_vm2, %v1095_v35, %v1089_v38  ;;  %v1039_v59 = vpack.c.bf16 %v484_v53, %v445_v15  ;;  %v1015_v62 = vpack.c.bf16 %v486_v57, %v447_v46  ;;  %v1042_v8 = vpack.c.bf16 %v485_v54, %v446_v45  ;;  %v1103_v9 = vpop.permute.xlu1 %1102  ;;  %v1098_v4 = vpop.permute.xlu0 %1097  ;;  %vm1019_vm12 = vmpackc.low %vm1431_vm13, %vm1406_vm1 }
 0x23f   :  { %v1018_v63 = vpack.c.bf16 %v487_v58, %v448_v47  ;;  %vm1907_vm2 = vnez %v1877_v56  ;;  %vm1914_vm13 = vmand %vm1423_vm4, %vm1334_vm11  ;;  %v1105_v17 = vunpack.i.h.bf16 %v1103_v9  ;;  %v1104_v25 = vunpack.i.l.bf16 %v1103_v9 }
 0x240   :  { %v1574_v50 = vsel %vm1914_vm13, 1, %v1173_v6  ;;  %v1100_v26 = vunpack.i.h.bf16 %v1098_v4  ;;  %v1099_v35 = vunpack.i.l.bf16 %v1098_v4  ;;  %vm1915_vm1 = vmpackc.low %vm1398_vm15, %vm1394_vm14  ;;  %vm1586_vm11 = vcmp.eq.s32.totalorder %v636_v31, 1 }
 0x241   :  { %1017 = vmatprep.subr.msk.bf16.mxu0 %vm1915_vm1, %v1015_v62  ;;  %vm1916_vm10 = vmpackc.low %vm1427_vm5, %vm1402_vm0  ;;  %v1918_v18 = vsel %vm1586_vm11, 4294967295, %v1917_v18  ;;  %vm1590_vm13 = vcmp.eq.s32.totalorder %v605_v32, 1  ;;  %v1922_v41 = vsel %vm1594_vm8, 4294967295, %v1921_v41  ;;  %v718_v24 = vrot.slane %v1574_v50, %v1350_v21 }
 0x242   :  { %1041 = vmatprep.subr.msk.bf16.mxu1 %vm1916_vm10, %v1039_v59  ;;  %1020 = vmatpush1.bf16.msk.msra.mxu0 %vm1019_vm12, %v1018_v63  ;;  %v1920_v19 = vsel %vm1590_vm13, 4294967295, %v1919_v19  ;;  %vm1923_vm14 = vmpackc.low %vm1907_vm2, %vm1437_vm3  ;;  %v1113_v42 = vpop.permute.xlu1 %1112  ;;  %v1108_v49 = vpop.permute.xlu0 %1107  ;;  %v687_v31 = vrot.slane %v1501_v34, %v1352_v22  ;;  %v675_v32 = vrot.slane %v1501_v34, %v1354_v23  ;;  %v683_v33 = vrot.slane %v1501_v34, %v1368_v29 }
 0x243   :  { %1044 = vmatpush1.bf16.msk.msra.mxu1 %vm1923_vm14, %v1042_v8  ;;  %v1115_v36 = vunpack.i.h.bf16 %v1113_v42  ;;  %v1114_v56 = vunpack.i.l.bf16 %v1113_v42  ;;  %v1110_v37 = vunpack.i.h.bf16 %v1108_v49  ;;  %v1109_v55 = vunpack.i.l.bf16 %v1108_v49 }
 0x244   :  { %vm1924_vm15 = vnez %v1879_v12  ;;  %vm1925_vm0 = vnez %v1881_v13  ;;  %vm1926_vm3 = vcmp.lt.s32.totalorder %v1366_v28, 15  ;;  %vm1930_vm1 = vnez %v1883_v14 }
 0x245   :  { %v523_v38 = vsel %vm1926_vm3, %v1104_v25, %v1105_v17  ;;  %vm1927_vm12 = vmmov %vm1926_vm3  ;;  %vm1931_vm14 = vnez %v1885_v16  ;;  %vm1932_vm13 = vcmp.lt.s32.totalorder %v1366_v28, 1  ;;  %vm1940_vm11 = vnez %v1900_v51 }
 0x246   :  { %v524_v15 = vsel %vm1927_vm12, %v1100_v26, %v1104_v25  ;;  %vm1928_vm10 = vmmov %vm1926_vm3  ;;  %v562_v47 = vsel %vm1932_vm13, %v1114_v56, %v1115_v36  ;;  %v1123_v8 = vpop.permute.xlu1 %1122  ;;  %v1118_v9 = vpop.permute.xlu0 %1117  ;;  %v726_v42 = vrot.slane %v1574_v50, %v1352_v22  ;;  %v714_v13 = vrot.slane %v1574_v50, %v1354_v23 }
 0x247   :  { %v525_v45 = vsel %vm1928_vm10, %v1099_v35, %v1100_v26  ;;  %vm1929_vm2 = vmmov %vm1926_vm3  ;;  %vm1936_vm10 = vnez %v1887_v27  ;;  %v1045_v58 = vpack.c.bf16 %v562_v47, %v523_v38  ;;  %v1125_v4 = vunpack.i.h.bf16 %v1123_v8 }
 0x248   :  { %v526_v46 = vsel %vm1929_vm2, %v1105_v17, %v1099_v35  ;;  %vm1933_vm5 = vmmov %vm1932_vm13  ;;  %vm1937_vm2 = vnez %v1889_v30  ;;  %vm1938_vm13 = vnez %v1892_v39  ;;  %v1124_v17 = vunpack.i.l.bf16 %v1123_v8 }
 0x249   :  { %v563_v53 = vsel %vm1933_vm5, %v1110_v37, %v1114_v56  ;;  %vm1934_vm3 = vmmov %vm1933_vm5  ;;  %vm1939_vm5 = vnez %v1894_v44  ;;  %v1120_v25 = vunpack.i.h.bf16 %v1118_v9  ;;  %v1119_v26 = vunpack.i.l.bf16 %v1118_v9 }
 0x24a   :  { %v564_v54 = vsel %vm1934_vm3, %v1109_v55, %v1110_v37  ;;  %vm1935_vm12 = vmmov %vm1934_vm3  ;;  %v1048_v63 = vpack.c.bf16 %v563_v53, %v524_v15  ;;  %vm1661_vm3 = vcmp.eq.s32.totalorder %v679_v40, 1  ;;  %v1944_v35 = vmov 0  ;;  %v1133_v27 = vpop.permute.xlu1 %1132  ;;  %v1128_v30 = vpop.permute.xlu0 %1127 }
 0x24b   :  { %v565_v57 = vsel %vm1935_vm12, %v1115_v36, %v1109_v55  ;;  %v1021_v59 = vpack.c.bf16 %v564_v54, %v525_v45  ;;  %vm1942_vm7 = vmpackc.low %vm1925_vm0, %vm1924_vm15  ;;  %v1945_v35 = vsel %vm1661_vm3, 4294967295, %v1944_v35  ;;  %v722_v12 = vrot.slane %v1574_v50, %v1368_v29 }
 0x24c   :  { %v1024_v62 = vpack.c.bf16 %v565_v57, %v526_v46  ;;  %vm1943_vm12 = vmpackc.low %vm1931_vm14, %vm1930_vm1  ;;  %vm1947_vm0 = vcmp.lt.s32.totalorder %v1366_v28, 127  ;;  %vm1952_vm15 = vnez %v1911_v11  ;;  %vm1709_vm3 = vcmp.eq.s32.totalorder %v718_v24, 1 }
 0x24d   :  { %1023 = vmatprep.subr.msk.bf16.mxu0 %vm1942_vm7, %v1021_v59  ;;  %1047 = vmatprep.subr.msk.bf16.mxu1 %vm1943_vm12, %v1045_v58  ;;  %vm1946_vm7 = vnez %v1857_v20  ;;  %v627_v14 = vsel %vm1947_vm0, %v1124_v17, %v1125_v4  ;;  %vm1948_vm1 = vmmov %vm1947_vm0  ;;  %vm1713_vm9 = vcmp.eq.s32.totalorder %v687_v31, 1  ;;  %v1135_v39 = vunpack.i.h.bf16 %v1133_v27 }
 0x24e   :  { %v628_v16 = vsel %vm1948_vm1, %v1120_v25, %v1124_v17  ;;  %vm1949_vm14 = vmmov %vm1947_vm0  ;;  %v1054_v50 = vpack.c.bf16 %v627_v14, %v1303_v61  ;;  %v1134_v44 = vunpack.i.l.bf16 %v1133_v27  ;;  %v1143_v52 = vpop.permute.xlu1 %1142 }
 0x24f   :  { %v629_v40 = vsel %vm1949_vm14, %v1119_v26, %v1120_v25  ;;  %vm1950_vm12 = vmmov %vm1947_vm0  ;;  %v1027_v36 = vpack.c.bf16 %v628_v16, %v1305_v5  ;;  %vm1956_vm14 = vnez %v1920_v19  ;;  %vm1737_vm0 = vcmp.eq.s32.totalorder %v726_v42, 1 }
 0x250   :  { %v630_v49 = vsel %vm1950_vm12, %v1125_v4, %v1119_v26  ;;  %vm1951_vm8 = vmpackc.low %vm1937_vm2, %vm1936_vm10  ;;  %v1030_v56 = vpack.c.bf16 %v629_v40, %v1301_v60  ;;  %vm1955_vm10 = vnez %v1918_v18  ;;  %vm1957_vm12 = vnez %v1922_v41  ;;  %v774_v4 = vld [vmem:[%s1829_s7] sm:$0xf]  ;;  %s1182_s7 = smov [#allocation2]  }
 0x251   :  { %1026 = vmatpush1.bf16.msk.msra.mxu0 %vm1951_vm8, %v1024_v62  ;;  %v1051_v37 = vpack.c.bf16 %v630_v49, %v1307_v7  ;;  %vm1953_vm1 = vmpackc.low %vm1939_vm5, %vm1938_vm13  ;;  %vm1954_vm8 = vnez %v1913_v43  ;;  %vm1717_vm13 = vcmp.eq.s32.totalorder %v675_v32, 1  ;;  %v1130_v43 = vunpack.i.h.bf16 %v1128_v30  ;;  %s949_s8 = sshll.u32 %s1182_s7, 4  ;;  %s950_s8 = int_to_ptr.vmem [resolvable:$true] %s949_s8 }
 0x252   :  { %1050 = vmatpush1.bf16.msk.msra.mxu1 %vm1953_vm1, %v1048_v63  ;;  %vm1031_vm2 = vmpackc.low %vm1955_vm10, %vm1954_vm8  ;;  %v1129_v18 = vunpack.i.l.bf16 %v1128_v30  ;;  %vm1966_vm8 = vnez %v1909_v10  ;;  %v1138_v10 = vpop.permute.xlu0 %1137  ;;  %v1145_v32 = vunpack.i.h.bf16 %v1143_v52  ;;  %v738_v57 = vpop.permute.xlu1 %737  ;;  %s1148_s16 = scalar_lea.vmem %s950_s8, 256  ;;  %p1153_p1 = scmp.lt.s32.totalorder %s950_s8, %s950_s8 }
 0x253   :  { %vm1964_vm5 = vmand %vm1423_vm4, %vm1946_vm7  ;;  %vm1741_vm4 = vcmp.eq.s32.totalorder %v714_v13, 1  ;;  %v1140_v55 = vunpack.i.h.bf16 %v1138_v10  ;;  %v1139_v38 = vunpack.i.l.bf16 %v1138_v10  ;;  %p1149_p0 = scmp.ne.s32.totalorder %s950_s8, %s1148_s16  ;;  %p1154_p2 = scmp.lt.s32.totalorder %s1148_s16, %s1148_s16 }
 0x254   :  { %v749_v7 = vsel %vm1964_vm5, 1, %v1173_v6  ;;  %vm1965_vm1 = vmpackc.low %vm1941_vm6, %vm1940_vm11  ;;  %vm1748_vm6 = vcmp.eq.s32.totalorder %v683_v33, 1  ;;  %vm1752_vm11 = vcmp.eq.s32.totalorder %v722_v12, 1  ;;  %v1144_v33 = vunpack.i.l.bf16 %v1143_v52 }
 0x255   :  { %1029 = vmatprep.subr.msk.bf16.mxu0 %vm1965_vm1, %v1027_v36  ;;  %vm1967_vm10 = vmpackc.low %vm1952_vm15, %vm1966_vm8  ;;  %v757_v11 = vrot.slane %v749_v7, %v1350_v21  ;;  %v765_v34 = vrot.slane %v749_v7, %v1352_v22  ;;  %v753_v24 = vrot.slane %v749_v7, %v1354_v23  ;;  %v761_v31 = vrot.slane %v749_v7, %v1368_v29  ;;  %p1155_p3 = por %p1154_p2, %p1153_p1 }
 0x256   :  { %1053 = vmatprep.subr.msk.bf16.mxu1 %vm1967_vm10, %v1051_v37  ;;  %1032 = vmatpush1.bf16.msk.msra.mxu0 %vm1031_vm2, %v1030_v56  ;;  %vm1976_vm7 = vmpackc.low %vm1957_vm12, %vm1956_vm14  ;;  %vm1977_vm15 = vnez %v1945_v35  ;;  %vm1978_vm14 = vcmp.lt.s32.totalorder %v1366_v28, 113  ;;  %vm1982_vm10 = vcmp.lt.s32.totalorder %v1366_v28, 112  ;;  %v736_v58 = vpop.permute.xlu0 %735  ;;  %v742_v59 = vpop.permute.xlu1 %741 }
 0x257   :  { %1056 = vmatpush1.bf16.msk.msra.mxu1 %vm1976_vm7, %v1054_v50  ;;  %vm1034_vm2 = vmpackc.low %vm1709_vm3, %vm1977_vm15  ;;  %v666_v19 = vsel %vm1978_vm14, %v1134_v44, %v1135_v39  ;;  %v705_v29 = vsel %vm1982_vm10, %v1144_v33, %v1145_v32  ;;  %vm781_vm3 = vcmask 588800   ;;  %p1156_p4 = pnand %p1155_p3, %p1149_p0 }
 0x258   :  { %vm1979_vm12 = vmmov %vm1978_vm14  ;;  %v1060_v46 = vpack.c.bf16 %v705_v29, %v666_v19 }
 0x259   :  { %v667_v21 = vsel %vm1979_vm12, %v1130_v43, %v1134_v44  ;;  %vm1980_vm5 = vmmov %vm1979_vm12 }
 0x25a   :  { %v668_v22 = vsel %vm1980_vm5, %v1129_v18, %v1130_v43  ;;  %vm1981_vm1 = vmmov %vm1980_vm5  ;;  %v740_v62 = vpop.permute.xlu0 %739 }
 0x25b   :  { %v669_v23 = vsel %vm1981_vm1, %v1135_v39, %v1129_v18  ;;  %vm1058_vm8 = vmpackc.low %vm1737_vm0, %vm1713_vm9  ;;  %vm743_vm0 = vcmp.lt.s32.totalorder %v1366_v28, 111  ;;  %vm766_vm1 = vcmp.eq.s32.totalorder %v753_v24, 1 }
 0x25c   :  { %vm1983_vm7 = vmmov %vm1982_vm10  ;;  %vm768_vm10 = vcmp.eq.s32.totalorder %v761_v31, 1  ;;  %v747_v63 = vsel %vm743_vm0, %v742_v59, %v736_v58  ;;  %v744_v8 = vsel %vm743_vm0, %v740_v62, %v742_v59  ;;  %v745_v9 = vsel %vm743_vm0, %v738_v57, %v740_v62 }
 0x25d   :  { %v706_v41 = vsel %vm1983_vm7, %v1140_v55, %v1144_v33  ;;  %vm1984_vm14 = vmmov %vm1983_vm7  ;;  %v746_v17 = vsel %vm743_vm0, %v736_v58, %v738_v57 }
 0x25e   :  { %v707_v15 = vsel %vm1984_vm14, %v1139_v38, %v1140_v55  ;;  %vm1985_vm12 = vmmov %vm1983_vm7  ;;  %v1033_v47 = vpack.c.bf16 %v706_v41, %v667_v21 }
 0x25f   :  { %v708_v45 = vsel %vm1985_vm12, %v1145_v32, %v1139_v38  ;;  %vm1037_vm5 = vmpackc.low %vm1741_vm4, %vm1717_vm13  ;;  %v1036_v53 = vpack.c.bf16 %v707_v15, %v668_v22  ;;  %vm767_vm13 = vcmp.eq.s32.totalorder %v757_v11, 1  ;;  %vm769_vm4 = vcmp.eq.s32.totalorder %v765_v34, 1 }
 0x260   :  { %v1057_v54 = vpack.c.bf16 %v708_v45, %v669_v23  ;;  %vm1061_vm9 = vmpackc.low %vm1752_vm11, %vm1748_vm6  ;;  %1035 = vmatprep.subr.msk.bf16.mxu0 %vm1034_vm2, %v1033_v47 }
 0x261   :  { %1038 = vmatpush1.bf16.msk.msra.mxu0 %vm1037_vm5, %v1036_v53 }
 0x262   :  { %1059 = vmatprep.subr.msk.bf16.mxu1 %vm1058_vm8, %v1057_v54  ;;  %985 = vmatprep.subr.msk.mxu0 %vm767_vm13, %v745_v9 }
 0x263   :  { %1062 = vmatpush1.bf16.msk.msra.mxu1 %vm1061_vm9, %v1060_v46 }
 0x264   :  { %1004 = vmatprep.subr.msk.mxu1 %vm769_vm4, %v747_v63 }
 0x265   :  { %986 = vmatpush1.msk.msra.mxu0 %vm766_vm1, %v746_v17 }
 0x266   :  { %987 = vmatmul.mubr.msk.f32.vlgmr.msra.gmra.mrb[8].mxu0 %vm781_vm3, %v774_v4 }
 0x267   :  { %1005 = vmatpush1.msk.msra.mxu1 %vm768_vm10, %v744_v8  ;;  %v779_v28 = vpop.permute.xlu0 %778 }
 0x268   :  { %1006 = vmatmul.mubr.msk.f32.vlgmr.msra.gmra.mrb[8].mxu1 %vm781_vm3, %v774_v4 }
 0x339   :  { %v851_v25 = vpop.f32.mrb[8].mxu0 }
 0x33a   :  { %v852_v35 = vadd.f32 %v851_v25, %v779_v28  ;;  %v853_v13 = vpop.f32.mrb[9].mxu0 }
 0x33b   :  { %v922_v26 = vpop.f32.mrb[8].mxu1  ;;  %v854_v14 = vadd.f32 %v853_v13, %v779_v28 }
 0x33c   :  { %v923_v42 = vadd.f32 %v922_v26, %v779_v28  ;;  %v924_v12 = vpop.f32.mrb[9].mxu1  ;;  %v929_v40 = vadd.f32 %v852_v35, %v1236_v0 }
 0x33d   :  { %v925_v16 = vadd.f32 %v924_v12, %v779_v28  ;;  %v930_v50 = vadd.f32 %v854_v14, %v1245_v2 }
 0x33e   :  { %v931_v49 = vadd.f32 %v923_v42, %v1241_v1 }
 0x33f   :  { %v932_v36 = vadd.f32 %v925_v16, %v1249_v3  ;;  %v937_v56 = vcombine.low %v929_v40, %v930_v50 }
 0x341   :  { %v938_v37 = vcombine.low %v931_v49, %v932_v36  ;;  %941 = vst [vmem:[#allocation2] sm:$0xff] %v937_v56 }
 0x343   :  { %942 = vst [vmem:[#allocation2 + $0x8] sm:$0xff] %v938_v37 }
 0x344   :  { %1159 = shalt.err (!%p1156_p4)
}
 0x345   :  { %s1160_s19 = scalar_lea.hbm %s1831_s9, 256 }
 0x346   :  { %p1161_p5 = scmp.ne.s32.totalorder %s1831_s9, %s1160_s19  ;;  %p1164_p6 = scmp.lt.u32.totalorder %s1160_s19, %s1831_s9 }
 0x348   :  { %p1166_p7 = pnand %p1164_p6, %p1161_p5 }
 0x34a   :  { %1169 = shalt.err (!%p1166_p7)
}
 0x34b   :  { %952 = dma.vmem_to_hbm [thread:$0]  %s950_s8, 256, %s1831_s9, [#allocation3]  }
 0x34c   :  { %1170 = dma.done.wait [#allocation3], 256  }
 0x34d   :  { %1171 = vsyncadd [#allocation3], 4294967040 }
 0x34e   :  { %956 = vsyncpa [#allocation3], 1 }

</bundles_post_ra>
